<compile_context>
chip_gen: v7x
topology: tpu7x:2x2x1
jax: 0.10.0
libtpu: 0.0.40
codegen_flags: <defaults>
</compile_context>

<pallas_src>
import jax
import jax.numpy as jnp
from jax.experimental import pallas as pl
from jax.experimental.pallas import tpu as pltpu


def _round_up(v, m):
    return (v + m - 1) // m * m


def _sublane(dtype):
    # rows packed per vreg sublane group for this dtype
    return {1: 32, 2: 16, 4: 8}.get(jnp.dtype(dtype).itemsize, 8)


def _vmem_budget_bytes():
    """Usable per-TensorCore VMEM budget derived from the actual chip, with headroom."""
    try:
        cap = int(pltpu.get_tpu_info().vmem_capacity_bytes)
    except Exception:
        cap = 64 * 2**20          # conservative (v7x-sized) fallback
    return (cap * 3) // 4          # ~48 MiB on v7x (64 MiB phys), ~96 MiB on v5e/v6e (128 MiB)


def _working_set_bytes(tm, tk, emb_pad, itemsize):
    dbl = 2 * itemsize                        # double-buffered pipeline stages
    return (dbl * (tm * emb_pad               # x tile
                   + emb_pad * tk             # w1 panel
                   + 8 * tk                   # b1 panel (sublane-padded)
                   + tk * emb_pad             # w2 panel
                   + 8 * emb_pad              # b2 (sublane-padded)
                   + tm * emb_pad)            # out tile
            + 4 * tm * emb_pad)               # resident f32 accumulator


def _select_tiles(m, emb_pad, hidden_pad, itemsize, budget, sublane):
    """Largest (tm, tk) whose double-buffered working set fits the VMEM budget.

    tm is prioritised over tk: weight panels are re-streamed from HBM once per row tile,
    so a big tm is what moves the kernel off the HBM roofline on v6e/v7x.
    """
    m_cap = _round_up(m, sublane)
    tm_cands = sorted({t for t in (1024, 768, 512, 384, 256, 128, 64, 32, 16, 8)
                       if t % sublane == 0 and t <= m_cap} | {m_cap}, reverse=True)
    tk_cands = [t for t in (1024, 512, 256, 128) if hidden_pad % t == 0]
    for tm in tm_cands:
        for tk in tk_cands:
            if _working_set_bytes(tm, tk, emb_pad, itemsize) <= budget:
                return tm, tk
    return tm_cands[-1], tk_cands[-1]


def _ffn_kernel(x_ref, w1_ref, b1_ref, w2_ref, b2_ref, o_ref, acc_ref):
    # x_ref:  [tm, E]    w1_ref: [E, tk]   b1_ref: [1, tk]
    # w2_ref: [tk, E]    b2_ref: [1, E]    o_ref:  [tm, E]   acc_ref: [tm, E] f32
    k = pl.program_id(1)

    @pl.when(k == 0)
    def _():
        # Fold b2 into the accumulator init (no extra (tm, E) add at the end).
        acc_ref[...] = jnp.broadcast_to(
            b2_ref[...].astype(jnp.float32), acc_ref.shape)

    # Linear 1 on the MXU: native (bf16-friendly) operands, f32 accumulation.
    h = jnp.dot(x_ref[...], w1_ref[...], preferred_element_type=jnp.float32)
    h = h + b1_ref[...].astype(jnp.float32)

    # GELU, tanh approximation, always in f32 (matches the PyTorch GELU module).
    c = jnp.float32(0.7978845608028654)  # sqrt(2 / pi)
    h = 0.5 * h * (1.0 + jnp.tanh(c * (h + 0.044715 * (h * h * h))))

    # Linear 2 on the MXU, accumulated into the resident f32 scratch.
    acc_ref[...] += jnp.dot(h.astype(w2_ref.dtype), w2_ref[...],
                            preferred_element_type=jnp.float32)

    @pl.when(k == pl.num_programs(1) - 1)
    def _():
        o_ref[...] = acc_ref[...].astype(o_ref.dtype)


def make_feed_forward(w1, b1, w2, b2, compute_dtype=None):
    """Pad (and optionally cast) the weights ONCE; return a jitted callable x -> FFN(x).

    w1: [emb, 4*emb], b1: [4*emb], w2: [4*emb, emb], b2: [emb].
    compute_dtype=jnp.bfloat16 enables the bf16 MXU path (f32 accumulation kept).
    Zero padding is mathematically inert: padded emb cols of x meet zero rows of w1,
    padded hidden cols give gelu(0)=0 against zero rows of w2, padded out cols are sliced off.
    """
    emb, hidden = w1.shape
    assert w2.shape == (hidden, emb) and b1.shape == (hidden,) and b2.shape == (emb,)

    emb_pad = _round_up(emb, 128)        # lane-dense activations / outputs
    hidden_pad = _round_up(hidden, 128)  # MXU-aligned reduction panels

    if compute_dtype is not None:
        w1 = w1.astype(compute_dtype)
        w2 = w2.astype(compute_dtype)
    if (emb_pad, hidden_pad) != (emb, hidden):
        w1 = jnp.pad(w1, ((0, emb_pad - emb), (0, hidden_pad - hidden)))
        w2 = jnp.pad(w2, ((0, hidden_pad - hidden), (0, emb_pad - emb)))
        b1 = jnp.pad(b1, (0, hidden_pad - hidden))
        b2 = jnp.pad(b2, (0, emb_pad - emb))
    b1_2d = b1.reshape(1, hidden_pad).astype(jnp.float32)   # biases are added in f32
    b2_2d = b2.reshape(1, emb_pad).astype(jnp.float32)

    vmem_budget = _vmem_budget_bytes()

    def fn(x):
        assert x.shape[-1] == emb
        out_dtype = x.dtype
        if compute_dtype is not None:
            x = x.astype(compute_dtype)
        itemsize = jnp.dtype(x.dtype).itemsize
        sublane = _sublane(x.dtype)

        lead = x.shape[:-1]
        m = 1
        for d in lead:
            m *= d

        tm, tk = _select_tiles(m, emb_pad, hidden_pad, itemsize, vmem_budget, sublane)
        m_pad = _round_up(m, tm)

        # Small M: ensure >= 2 row tiles so both TensorCores on dual-TC chips (v7x) get
        # work; cheap because the whole problem is tiny in this regime.
        if m_pad // tm < 2 and sublane < m <= 512:
            tm = _round_up(-(-m // 2), sublane)
            m_pad = _round_up(m, tm)

        x2d = x.reshape(m, emb)
        if (m_pad, emb_pad) != (m, emb):
            x2d = jnp.pad(x2d, ((0, m_pad - m), (0, emb_pad - emb)))

        grid = (m_pad // tm, hidden_pad // tk)

        # Real HBM traffic: weight panels are re-streamed once per row tile.
        cost = pl.CostEstimate(
            flops=4 * m * hidden * emb,                  # two matmuls: 2*M*E*H each
            transcendentals=m * hidden,                  # tanh
            bytes_accessed=(itemsize * 2 * m_pad * emb_pad              # x in + out
                            + grid[0] * (itemsize * 2 * emb_pad * hidden_pad   # w1 + w2
                                         + 4 * (hidden_pad + emb_pad))),        # biases
        )

        grid_spec = pltpu.PrefetchScalarGridSpec(
            num_scalar_prefetch=0,
            grid=grid,
            in_specs=[
                pl.BlockSpec((tm, emb_pad), lambda i, k: (i, 0)),      # x
                pl.BlockSpec((emb_pad, tk), lambda i, k: (0, k)),      # w1
                pl.BlockSpec((1, tk), lambda i, k: (0, k)),            # b1
                pl.BlockSpec((tk, emb_pad), lambda i, k: (k, 0)),      # w2
                pl.BlockSpec((1, emb_pad), lambda i, k: (0, 0)),       # b2
            ],
            out_specs=pl.BlockSpec((tm, emb_pad), lambda i, k: (i, 0)),
            scratch_shapes=[pltpu.VMEM((tm, emb_pad), jnp.float32)],
        )

        out2d = pl.pallas_call(
            _ffn_kernel,
            out_shape=jax.ShapeDtypeStruct((m_pad, emb_pad), out_dtype),
            grid_spec=grid_spec,
            compiler_params=pltpu.CompilerParams(
                dimension_semantics=("parallel", "arbitrary"),
                vmem_limit_bytes=int(vmem_budget),
            ),
            cost_estimate=cost,
        )(x2d, w1, b1_2d, w2, b2_2d)

        return out2d[:m, :emb].reshape(*lead, emb)

    return jax.jit(fn)


def feed_forward(x, w1, b1, w2, b2, compute_dtype=None):
    """One-shot convenience wrapper (weights padded per call; prefer make_feed_forward)."""
    return make_feed_forward(w1, b1, w2, b2, compute_dtype=compute_dtype)(x)


def reference_ffn(x, w1, b1, w2, b2):
    h = x @ w1 + b1
    h = 0.5 * h * (1.0 + jnp.tanh(jnp.sqrt(2.0 / jnp.pi) * (h + 0.044715 * h ** 3)))
    return h @ w2 + b2


if __name__ == "__main__":
    # cfg['emb_dim'] = 32 -> hidden = 128;  x: [batch=2, seq=8, emb=32]
    emb_dim = 32
    hidden = 4 * emb_dim
    batch, seq = 2, 8

    key = jax.random.PRNGKey(0)
    kx, kw1, kb1, kw2, kb2 = jax.random.split(key, 5)

    x = jax.random.normal(kx, (batch, seq, emb_dim), dtype=jnp.float32)
    # Deterministic parameter init (uniform like PyTorch Linear default bounds)
    bound1 = 1.0 / (emb_dim ** 0.5)
    bound2 = 1.0 / (hidden ** 0.5)
    w1 = jax.random.uniform(kw1, (emb_dim, hidden), jnp.float32, -bound1, bound1)
    b1 = jax.random.uniform(kb1, (hidden,), jnp.float32, -bound1, bound1)
    w2 = jax.random.uniform(kw2, (hidden, emb_dim), jnp.float32, -bound2, bound2)
    b2 = jax.random.uniform(kb2, (emb_dim,), jnp.float32, -bound2, bound2)

    ref = reference_ffn(x, w1, b1, w2, b2)

    # f32 path (exact match to the PyTorch module semantics).
    ffn_f32 = make_feed_forward(w1, b1, w2, b2)
    out = jax.block_until_ready(ffn_f32(x))
    assert out.shape == (batch, seq, emb_dim)
    assert jnp.allclose(out, ref, atol=1e-5, rtol=1e-5), "f32 mismatch vs reference"

    # bf16 compute path (bf16 MXU operands, f32 accumulation) -> looser tolerance.
    ffn_bf16 = make_feed_forward(w1, b1, w2, b2, compute_dtype=jnp.bfloat16)
    out_bf16 = jax.block_until_ready(ffn_bf16(x))
    assert out_bf16.shape == (batch, seq, emb_dim)
    assert out_bf16.dtype == x.dtype
    assert jnp.allclose(out_bf16, ref, atol=5e-2, rtol=5e-2), "bf16 mismatch vs reference"

    print("KERNEL_OK")
</pallas_src>

<mosaic_0001>
module attributes {stable_mosaic.version = 11 : i64} {
  func.func @_ffn_kernel(%arg0: i32, %arg1: i32, %arg2: memref<8x128xf32, #tpu.memory_space<vmem>>, %arg3: memref<128x128xf32, #tpu.memory_space<vmem>>, %arg4: memref<1x128xf32, #tpu.memory_space<vmem>>, %arg5: memref<128x128xf32, #tpu.memory_space<vmem>>, %arg6: memref<1x128xf32, #tpu.memory_space<vmem>>, %arg7: memref<8x128xf32, #tpu.memory_space<vmem>>, %arg8: memref<8x128xf32, #tpu.memory_space<vmem>>) attributes {dimension_semantics = [#tpu.dimension_semantics<parallel>, #tpu.dimension_semantics<arbitrary>], iteration_bounds = array<i64: 2, 1>, scalar_prefetch = 0 : i64, scratch_operands = 1 : i64, tpu.core_type = #tpu.core_type<tc>, window_params = [{transform_indices = @transform_0, window_bounds = array<i64: 8, 128>}, {transform_indices = @transform_1, window_bounds = array<i64: 128, 128>}, {transform_indices = @transform_2, window_bounds = array<i64: 1, 128>}, {transform_indices = @transform_3, window_bounds = array<i64: 128, 128>}, {pipeline_mode = #tpu.pipeline_mode<synchronous>, transform_indices = @transform_4, window_bounds = array<i64: 1, 128>}, {transform_indices = @transform_5, window_bounds = array<i64: 8, 128>}]} {
    %c0_i32 = arith.constant 0 : i32
    %0 = arith.cmpi eq, %arg1, %c0_i32 : i32
    %1 = arith.extui %0 : i1 to i32
    %c0_i32_0 = arith.constant 0 : i32
    %2 = arith.cmpi ne, %1, %c0_i32_0 : i32
    scf.if %2 {
      %c0_19 = arith.constant 0 : index
      %c0_20 = arith.constant 0 : index
      %30 = vector.load %arg6[%c0_19, %c0_20] : memref<1x128xf32, #tpu.memory_space<vmem>>, vector<1x128xf32>
      %31 = vector.shape_cast %30 : vector<1x128xf32> to vector<1x128xf32>
      %32 = vector.broadcast %31 : vector<1x128xf32> to vector<8x128xf32>
      %c0_21 = arith.constant 0 : index
      %c0_22 = arith.constant 0 : index
      %33 = vector.load %arg8[%c0_21, %c0_22] : memref<8x128xf32, #tpu.memory_space<vmem>>, vector<8x128xf32>
      tpu.vector_store %arg8[%c0_21, %c0_22], %32 {strides = array<i32>} : memref<8x128xf32, #tpu.memory_space<vmem>>, vector<8x128xf32>,
    } else {
    }
    %c0 = arith.constant 0 : index
    %c0_1 = arith.constant 0 : index
    %3 = vector.load %arg2[%c0, %c0_1] : memref<8x128xf32, #tpu.memory_space<vmem>>, vector<8x128xf32>
    %c0_2 = arith.constant 0 : index
    %c0_3 = arith.constant 0 : index
    %4 = vector.load %arg3[%c0_2, %c0_3] : memref<128x128xf32, #tpu.memory_space<vmem>>, vector<128x128xf32>
    %cst = arith.constant dense<0.000000e+00> : vector<8x128xf32>
    %5 = tpu.matmul %3, %4, %cst {dimension_numbers = #tpu.dot_dimension_numbers<[1], [0], [0], [1], [0, 0, 1, 1], [], []>} : vector<8x128xf32>, vector<128x128xf32>, vector<8x128xf32> -> vector<8x128xf32>
    %c0_4 = arith.constant 0 : index
    %c0_5 = arith.constant 0 : index
    %6 = vector.load %arg4[%c0_4, %c0_5] : memref<1x128xf32, #tpu.memory_space<vmem>>, vector<1x128xf32>
    %7 = vector.broadcast %6 : vector<1x128xf32> to vector<8x128xf32>
    %8 = arith.addf %5, %7 : vector<8x128xf32>
    %cst_6 = arith.constant 5.000000e-01 : f32
    %9 = vector.broadcast %cst_6 : f32 to vector<8x128xf32>
    %10 = arith.mulf %9, %8 : vector<8x128xf32>
    %11 = arith.mulf %8, %8 : vector<8x128xf32>
    %12 = arith.mulf %11, %8 : vector<8x128xf32>
    %cst_7 = arith.constant 4.471500e-02 : f32
    %13 = vector.broadcast %cst_7 : f32 to vector<8x128xf32>
    %14 = arith.mulf %13, %12 : vector<8x128xf32>
    %15 = arith.addf %8, %14 : vector<8x128xf32>
    %cst_8 = arith.constant 0.797884583 : f32
    %16 = vector.broadcast %cst_8 : f32 to vector<8x128xf32>
    %17 = arith.mulf %16, %15 : vector<8x128xf32>
    %18 = math.tanh %17 : vector<8x128xf32>
    %cst_9 = arith.constant 1.000000e+00 : f32
    %19 = vector.broadcast %cst_9 : f32 to vector<8x128xf32>
    %20 = arith.addf %19, %18 : vector<8x128xf32>
    %21 = arith.mulf %10, %20 : vector<8x128xf32>
    %c0_10 = arith.constant 0 : index
    %c0_11 = arith.constant 0 : index
    %22 = vector.load %arg8[%c0_10, %c0_11] : memref<8x128xf32, #tpu.memory_space<vmem>>, vector<8x128xf32>
    %c0_12 = arith.constant 0 : index
    %c0_13 = arith.constant 0 : index
    %23 = vector.load %arg5[%c0_12, %c0_13] : memref<128x128xf32, #tpu.memory_space<vmem>>, vector<128x128xf32>
    %cst_14 = arith.constant dense<0.000000e+00> : vector<8x128xf32>
    %24 = tpu.matmul %21, %23, %cst_14 {dimension_numbers = #tpu.dot_dimension_numbers<[1], [0], [0], [1], [0, 0, 1, 1], [], []>} : vector<8x128xf32>, vector<128x128xf32>, vector<8x128xf32> -> vector<8x128xf32>
    %25 = arith.addf %22, %24 : vector<8x128xf32>
    %c0_15 = arith.constant 0 : index
    %c0_16 = arith.constant 0 : index
    %26 = vector.load %arg8[%c0_15, %c0_16] : memref<8x128xf32, #tpu.memory_space<vmem>>, vector<8x128xf32>
    tpu.vector_store %arg8[%c0_15, %c0_16], %25 {strides = array<i32>} : memref<8x128xf32, #tpu.memory_space<vmem>>, vector<8x128xf32>,
    %c0_i32_17 = arith.constant 0 : i32
    %27 = arith.cmpi eq, %arg1, %c0_i32_17 : i32
    %28 = arith.extui %27 : i1 to i32
    %c0_i32_18 = arith.constant 0 : i32
    %29 = arith.cmpi ne, %28, %c0_i32_18 : i32
    scf.if %29 {
      %c0_19 = arith.constant 0 : index
      %c0_20 = arith.constant 0 : index
      %30 = vector.load %arg8[%c0_19, %c0_20] : memref<8x128xf32, #tpu.memory_space<vmem>>, vector<8x128xf32>
      %c0_21 = arith.constant 0 : index
      %c0_22 = arith.constant 0 : index
      %31 = vector.load %arg7[%c0_21, %c0_22] : memref<8x128xf32, #tpu.memory_space<vmem>>, vector<8x128xf32>
      tpu.vector_store %arg7[%c0_21, %c0_22], %30 {strides = array<i32>} : memref<8x128xf32, #tpu.memory_space<vmem>>, vector<8x128xf32>,
    } else {
    }
    return
  }
  func.func @transform_0(%arg0: i32, %arg1: i32) -> (i32, i32) {
    %c0_i32 = arith.constant 0 : i32
    %c0_i32_0 = arith.constant 0 : i32
    return %arg0, %c0_i32 : i32, i32
  }
  func.func @transform_1(%arg0: i32, %arg1: i32) -> (i32, i32) {
    %c0_i32 = arith.constant 0 : i32
    %c0_i32_0 = arith.constant 0 : i32
    return %c0_i32, %arg1 : i32, i32
  }
  func.func @transform_2(%arg0: i32, %arg1: i32) -> (i32, i32) {
    %c0_i32 = arith.constant 0 : i32
    %c0_i32_0 = arith.constant 0 : i32
    return %c0_i32, %arg1 : i32, i32
  }
  func.func @transform_3(%arg0: i32, %arg1: i32) -> (i32, i32) {
    %c0_i32 = arith.constant 0 : i32
    %c0_i32_0 = arith.constant 0 : i32
    return %arg1, %c0_i32 : i32, i32
  }
  func.func @transform_4(%arg0: i32, %arg1: i32) -> (i32, i32) {
    %c0_i32 = arith.constant 0 : i32
    %c0_i32_0 = arith.constant 0 : i32
    %c0_i32_1 = arith.constant 0 : i32
    return %c0_i32, %c0_i32_0 : i32, i32
  }
  func.func @transform_5(%arg0: i32, %arg1: i32) -> (i32, i32) {
    %c0_i32 = arith.constant 0 : i32
    %c0_i32_0 = arith.constant 0 : i32
    return %arg0, %c0_i32 : i32, i32
  }
}

</mosaic_0001>

<bundles_post_ra>
// kernel: fn.1
= control target key start
LH: loop header
LB: loop body
LE: loop exit
PB: predicated region body
PF: predicated region fallthrough
CT: control target
= control target key end

     0   :  { %10 = vsyncpa [#allocation4], 0  ;;  %s1088_s0 = inlined_call_operand.vmem [shape: f32[16,128], index: 0, kind: input, shape index: {}]   ;;  %s1089_s1 = inlined_call_operand.hbm [shape: f32[128,128], index: 1, kind: input, shape index: {}]   ;;  %s1090_s2 = inlined_call_operand.vmem [shape: f32[1,128], index: 2, kind: input, shape index: {}]   ;;  %s1091_s3 = inlined_call_operand.hbm [shape: f32[128,128], index: 3, kind: input, shape index: {}]   ;;  %s1092_s4 = inlined_call_operand.vmem [shape: f32[1,128], index: 4, kind: input, shape index: {}]   ;;  %s1093_s5 = inlined_call_operand.vmem [shape: f32[16,128], index: 5, kind: output, shape index: {}]  }
   0x1   :  { %11 = vsyncpa [#allocation6], 0  ;;  %s946_s18 = smov 0   ;;  %s948_s19 = smov 0  }
   0x2   :  { %s950_s20 = smov 0  }
   0x3 LB: > { %s601_s21 = sadd.s32 4294967295, %s907_s20   ;;  %s29_s22 = sadd.s32 1, %s903_s19  ;;  %s907_s20 = sphi %s950_s20, %s17_s20   ;;  %s903_s19 = sphi %s948_s19, %s1103_s19   ;;  %s899_s18 = sphi %s946_s18, %s1102_s18  }
   0x4   : > { %p31_p0 = scmp.ge.s32.totalorder %s29_s22, 2  ;;  %p603_p1 = scmp.ge.s32.totalorder %s907_s20, 1 }
   0x5   : > { %p185_p2 = scmp.lt.s32.totalorder %s907_s20, 3  ;;  %p971_p4 = scmp.eq.s32.totalorder %s601_s21, 0 }
   0x6   : > { %s1105_s22 = smov (%p31_p0, %s29_s22), 0  ;;  %s909_s25 = smov [#allocation3]  }
   0x7   : > { %p967_p3 = pnand %p603_p1, %p185_p2  ;;  %s199_s26 = sshll.u32 %s909_s25, 4  ;;  %s200_s26 = int_to_ptr.vmem [resolvable:$true] %s199_s26 }
   0x8   : > { %s1098_s24 = scalar_select %p971_p4, 1, 0 }
   0x9   : > { %s1097_s23 = scalar_select %p967_p3, 1, 0 }
   0xa   : > { %p777_p5 = pneg %p967_p3  ;;  %s910_s28 = smov [#allocation5]  }
   0xb   : > { %s221_s29 = sshll.u32 %s910_s28, 4  ;;  %s821_s7 = scalar_lea.hbm %s1089_s1, 2048  ;;  %s983_s29 = int_to_ptr.vmem [resolvable:$true] %s221_s29 }
   0xc   : > { %p979_p6 = pnand %p971_p4, %p777_p5  ;;  %p822_p7 = scmp.ne.s32.totalorder %s1089_s1, %s821_s7 }
   0xd   : > { %p828_p11 = scmp.lt.u32.totalorder %s821_s7, %s1089_s1 }
   0xe   : > { %p823_p8 = pneg %p979_p6 }
  0x10   : > { %p824_p9 = pnand %p823_p8, %p822_p7 }
  0x12   : > { %p825_p10 = pneg %p824_p9 }
  0x14   : > { %p830_p12 = pnand %p828_p11, %p825_p10 }
  0x16   : > { %833 = shalt.err (!%p830_p12)
}
  0x17   : > { %s834_s12 = scalar_lea.vmem %s200_s26, 2048  ;;  %p842_p2 = scmp.lt.s32.totalorder %s200_s26, %s200_s26 }
  0x18   : > { %p835_p13 = scmp.ne.s32.totalorder %s200_s26, %s834_s12  ;;  %p843_p5 = scmp.lt.s32.totalorder %s834_s12, %s834_s12 }
  0x1a   : > { %p837_p0 = pnand %p835_p13, %p823_p8  ;;  %p844_p4 = por %p843_p5, %p842_p2 }
  0x1c   : > { %p838_p1 = pneg %p837_p0 }
  0x1e   : > { %p845_p3 = pnand %p844_p4, %p838_p1 }
  0x20   : > { %848 = shalt.err (!%p845_p3)
}
  0x21   : > { %s911_s13 = smov 128   ;;  %s912_s14 = smov 8  }
  0x22   : > { %780 = dma.hbm_to_vmem [thread:$0]  (!%p979_p6), %s1089_s1, 2048, %s200_s26, [#allocation4], %s911_s13, %s911_s13, %s912_s14  }
  0x23   : > { %s849_s25 = scalar_lea.hbm %s1091_s3, 2048 }
  0x24   : > { %p850_p7 = scmp.ne.s32.totalorder %s1091_s3, %s849_s25  ;;  %p856_p9 = scmp.lt.u32.totalorder %s849_s25, %s1091_s3 }
  0x26   : > { %p852_p3 = pnand %p850_p7, %p823_p8 }
  0x28   : > { %p853_p4 = pneg %p852_p3 }
  0x2a   : > { %p858_p10 = pnand %p856_p9, %p853_p4 }
  0x2c   : > { %861 = shalt.err (!%p858_p10)
}
  0x2d   : > { %s862_s26 = scalar_lea.vmem %s983_s29, 2048  ;;  %p870_p0 = scmp.lt.s32.totalorder %s983_s29, %s983_s29 }
  0x2e   : > { %p863_p11 = scmp.ne.s32.totalorder %s983_s29, %s862_s26  ;;  %p871_p1 = scmp.lt.s32.totalorder %s862_s26, %s862_s26 }
  0x30   : > { %p865_p12 = pnand %p863_p11, %p823_p8  ;;  %p872_p2 = por %p871_p1, %p870_p0 }
  0x32   : > { %p866_p13 = pneg %p865_p12 }
  0x34   : > { %p873_p5 = pnand %p872_p2, %p866_p13 }
  0x36   : > { %876 = shalt.err (!%p873_p5)
}
  0x37   : > { %783 = dma.hbm_to_vmem [thread:$0]  (!%p979_p6), %s1091_s3, 2048, %s983_s29, [#allocation6], %s911_s13, %s911_s13, %s912_s14  }
  0x38   : > { %p1100_p7 = scmp.ne.s32.totalorder %s1097_s23, 0 }
  0x39   : > { %p1101_p3 = scmp.ne.s32.totalorder (!%p1100_p7), %s1098_s24, 0 }
  0x3a   : > { %247 = sbr.rel (%p1100_p7) target bundleno = 557 (0x22d), region = 40 }
  0x41   : > { %890 = dma.done.wait (%p1101_p3), [#allocation4], 2048  }
  0x42   : > { %892 = vsyncadd (%p1101_p3), [#allocation4], 4294965248 }
  0x43   : > { %894 = dma.done.wait (%p1101_p3), [#allocation6], 2048  }
  0x44   : > { %896 = vsyncadd (%p1101_p3), [#allocation6], 4294965248  ;;  %v913_v0 = vmov 0.0|0.0   ;;  %vm914_vm0 = vmmov 0   ;;  %v915_v1 = vmov 0.0   ;;  %v305_v2 = vld [vmem:[#allocation3] sm:$0xff] }
  0x45   : > { %721 = vmatprep.subr.bf16.mxu0 %v913_v0  ;;  %683 = vmatprep.mubr.msk.f32.mxu0 %vm914_vm0, %v915_v1  ;;  %v306_v3 = vld [vmem:[#allocation3 + $0x8] sm:$0xff]  ;;  %v307_v4 = vld [vmem:[#allocation3 + $0x10] sm:$0xff]  ;;  %v308_v6 = vld [vmem:[#allocation3 + $0x18] sm:$0xff]  ;;  %p280_p6 = scmp.lt.s32.totalorder %s899_s18, 1 }
  0x46   : > { %745 = vmatprep.subr.bf16.mxu1 %v913_v0  ;;  %718 = vmatprep.mubr.msk.f32.mxu1 %vm914_vm0, %v915_v1  ;;  %v722_v5 = vpack.c.bf16 %v306_v3, %v305_v2  ;;  %v725_v7 = vpack.c.bf16 %v308_v6, %v307_v4  ;;  %v309_v8 = vld [vmem:[#allocation3 + $0x20] sm:$0xff]  ;;  %v310_v9 = vld [vmem:[#allocation3 + $0x28] sm:$0xff]  ;;  %v311_v14 = vld [vmem:[#allocation3 + $0x30] sm:$0xff] }
  0x47   : > { %v408_v10 = vld [vmem:[#allocation5] sm:$0xff]  ;;  %v409_v11 = vld [vmem:[#allocation5 + $0x8] sm:$0xff]  ;;  %v728_v12 = vpack.c.bf16 %v310_v9, %v309_v8  ;;  %v312_v15 = vld [vmem:[#allocation3 + $0x38] sm:$0xff]  ;;  %s1107_s18 = smov (!%p280_p6, %s899_s18), 1 }
  0x48   : > { %723 = vmatpush3.bf16.msra.mxu0 %v722_v5  ;;  %v746_v13 = vpack.c.bf16 %v409_v11, %v408_v10  ;;  %v731_v16 = vpack.c.bf16 %v312_v15, %v311_v14  ;;  %v313_v17 = vld [vmem:[#allocation3 + $0x40] sm:$0xff]  ;;  %v314_v18 = vld [vmem:[#allocation3 + $0x48] sm:$0xff]  ;;  %v315_v20 = vld [vmem:[#allocation3 + $0x50] sm:$0xff]  ;;  %s611_s23 = sshll.u32 %s1107_s18, 3 }
  0x49   : > { %724 = vmatprep.subr.bf16.mxu0 %v913_v0  ;;  %v734_v19 = vpack.c.bf16 %v314_v18, %v313_v17  ;;  %v316_v21 = vld [vmem:[#allocation3 + $0x58] sm:$0xff]  ;;  %v317_v23 = vld [vmem:[#allocation3 + $0x60] sm:$0xff]  ;;  %v318_v24 = vld [vmem:[#allocation3 + $0x68] sm:$0xff]  ;;  %s283_s29 = scalar_lea.vmem %s1088_s0, %s611_s23  ;;  %s291_s16 = scalar_lea.vmem %s1093_s5, %s611_s23 }
  0x4a   : > { %747 = vmatpush3.bf16.msra.mxu1 %v746_v13  ;;  %v737_v22 = vpack.c.bf16 %v316_v21, %v315_v20  ;;  %v740_v25 = vpack.c.bf16 %v318_v24, %v317_v23  ;;  %v319_v26 = vld [vmem:[#allocation3 + $0x70] sm:$0xff]  ;;  %v320_v27 = vld [vmem:[#allocation3 + $0x78] sm:$0xff]  ;;  %v304_v29 = vld [vmem:[%s283_s29] sm:$0xff] }
  0x4b   : > { %748 = vmatprep.subr.bf16.mxu1 %v913_v0  ;;  %v743_v28 = vpack.c.bf16 %v320_v27, %v319_v26  ;;  %v410_v30 = vld [vmem:[#allocation5 + $0x10] sm:$0xff]  ;;  %v411_v31 = vld [vmem:[#allocation5 + $0x18] sm:$0xff]  ;;  %v412_v33 = vld [vmem:[#allocation5 + $0x20] sm:$0xff] }
  0x4c   : > { %726 = vmatpush3.bf16.msra.mxu0 %v725_v7  ;;  %v749_v32 = vpack.c.bf16 %v411_v31, %v410_v30  ;;  %v413_v34 = vld [vmem:[#allocation5 + $0x28] sm:$0xff]  ;;  %v414_v36 = vld [vmem:[#allocation5 + $0x30] sm:$0xff]  ;;  %v415_v37 = vld [vmem:[#allocation5 + $0x38] sm:$0xff] }
  0x4d   : > { %727 = vmatprep.subr.bf16.mxu0 %v913_v0  ;;  %v752_v35 = vpack.c.bf16 %v413_v34, %v412_v33  ;;  %v755_v38 = vpack.c.bf16 %v415_v37, %v414_v36  ;;  %v416_v39 = vld [vmem:[#allocation5 + $0x40] sm:$0xff]  ;;  %v417_v40 = vld [vmem:[#allocation5 + $0x48] sm:$0xff]  ;;  %v418_v42 = vld [vmem:[#allocation5 + $0x50] sm:$0xff] }
  0x4e   : > { %750 = vmatpush3.bf16.msra.mxu1 %v749_v32  ;;  %v758_v41 = vpack.c.bf16 %v417_v40, %v416_v39  ;;  %v419_v43 = vld [vmem:[#allocation5 + $0x58] sm:$0xff]  ;;  %v420_v45 = vld [vmem:[#allocation5 + $0x60] sm:$0xff]  ;;  %v421_v46 = vld [vmem:[#allocation5 + $0x68] sm:$0xff] }
  0x4f   : > { %751 = vmatprep.subr.bf16.mxu1 %v913_v0  ;;  %v761_v44 = vpack.c.bf16 %v419_v43, %v418_v42  ;;  %v764_v47 = vpack.c.bf16 %v421_v46, %v420_v45  ;;  %v422_v48 = vld [vmem:[#allocation5 + $0x70] sm:$0xff]  ;;  %v423_v49 = vld [vmem:[#allocation5 + $0x78] sm:$0xff]  ;;  %v614_v51 = vld [vmem:[%s1090_s2] ss:$0 sm:$0xff] }
  0x50   : > { %729 = vmatpush3.bf16.msra.mxu0 %v728_v12  ;;  %v767_v50 = vpack.c.bf16 %v423_v49, %v422_v48 }
  0x51   : > { %730 = vmatprep.subr.bf16.mxu0 %v913_v0 }
  0x52   : > { %753 = vmatpush3.bf16.msra.mxu1 %v752_v35 }
  0x53   : > { %754 = vmatprep.subr.bf16.mxu1 %v913_v0 }
  0x54   : > { %732 = vmatpush3.bf16.msra.mxu0 %v731_v16 }
  0x55   : > { %733 = vmatprep.subr.bf16.mxu0 %v913_v0 }
  0x56   : > { %756 = vmatpush3.bf16.msra.mxu1 %v755_v38 }
  0x57   : > { %757 = vmatprep.subr.bf16.mxu1 %v913_v0 }
  0x58   : > { %735 = vmatpush3.bf16.msra.mxu0 %v734_v19 }
  0x59   : > { %736 = vmatprep.subr.bf16.mxu0 %v913_v0 }
  0x5a   : > { %759 = vmatpush3.bf16.msra.mxu1 %v758_v41 }
  0x5b   : > { %760 = vmatprep.subr.bf16.mxu1 %v913_v0 }
  0x5c   : > { %738 = vmatpush3.bf16.msra.mxu0 %v737_v22 }
  0x5d   : > { %739 = vmatprep.subr.bf16.mxu0 %v913_v0 }
  0x5e   : > { %762 = vmatpush3.bf16.msra.mxu1 %v761_v44 }
  0x5f   : > { %763 = vmatprep.subr.bf16.mxu1 %v913_v0 }
  0x60   : > { %741 = vmatpush3.bf16.msra.mxu0 %v740_v25 }
  0x61   : > { %742 = vmatprep.subr.bf16.mxu0 %v913_v0 }
  0x62   : > { %765 = vmatpush3.bf16.msra.mxu1 %v764_v47 }
  0x63   : > { %766 = vmatprep.subr.bf16.mxu1 %v913_v0  ;;  %v613_v0 = vld [vmem:[%s1092_s4] ss:$0 sm:$0xff] }
  0x64   : > { %744 = vmatpush3.bf16.msra.mxu0 %v743_v28 }
  0x66   : > { %768 = vmatpush3.bf16.msra.mxu1 %v767_v50 }
  0x67   : > { %684 = vmatmul.mubr.f32.vlgmr.msra.gmra.mrb[0].mxu0 %v304_v29 }
 0x13a   : > { %v394_v52 = vpop.f32.mrb[0].mxu0 }
 0x13b   : > { %v395_v53 = vadd.f32 %v614_v51, %v394_v52  ;;  %v685_v54 = vpop.f32.mrb[1].mxu0 }
 0x13d   : > { %v399_v55 = vmul.f32 %v395_v53, %v395_v53  ;;  %v398_v61 = vmul.f32 0.5, %v395_v53 }
 0x13f   : > { %v400_v56 = vmul.f32 %v399_v55, %v395_v53 }
 0x141   : > { %v401_v57 = vmul.f32 0.044715, %v400_v56 }
 0x143   : > { %v402_v58 = vadd.f32 %v401_v57, %v395_v53 }
 0x145   : > { %v403_v59 = vmul.f32 0.7978846, %v402_v58 }
 0x147   : > { %819 = vtanh.f32 %v403_v59 }
 0x151   : > { %v820_v60 = vpop.eup %819 }
 0x152   : > { %v405_v62 = vadd.f32 1.0, %v820_v60 }
 0x154   : > { %v406_v63 = vmul.f32 %v405_v62, %v398_v61 }
 0x156   : > { %719 = vmatmul.mubr.f32.vlgmr.msra.gmra.mrb[0].mxu1 %v406_v63 }
 0x229   : > { %v490_v1 = vpop.f32.mrb[0].mxu1 }
 0x22a   : > { %v494_v2 = vadd.f32 %v613_v0, %v490_v1  ;;  %v720_v3 = vpop.f32.mrb[1].mxu1 }
 0x22c   : > { %500 = vst [vmem:[%s291_s16] sm:$0xff] %v494_v2 }
 0x22d PF: > { %s17_s20 = sadd.s32 1, %s907_s20   ;;  %s1102_s18 = smov %s903_s19 }
 0x22e   : > { %p14_p8 = scmp.ge.s32.totalorder %s17_s20, 4   ;;  %s1103_s19 = smov %s1105_s22 }
 0x230   :  { %16 = sbr.rel (!%p14_p8) target bundleno = 3 (0x3), region = 92 }
 0x237   :  { %520 = vsyncpa [#allocation4], 1 }
 0x238   :  { %522 = vsyncpa [#allocation4 + $0x1], 1 }
 0x239   :  { %523 = vsyncpa [#allocation6], 1 }

</bundles_post_ra>
